<compile_context>
chip_gen: v5e
topology: v5e:2x2
jax: 0.10.0
libtpu: 0.0.40
codegen_flags: <defaults>
</compile_context>

<pallas_src>
import jax
import jax.numpy as jnp
from jax.experimental import pallas as pl
from jax.experimental.pallas import tpu as pltpu


def _conj_kernel(m_ref, x_ref, o_ref):
    """One lane-dense MXU matmul: (row_tile, 128) @ (128, 128)."""
    x = x_ref[...].astype(jnp.float32)
    o_ref[...] = jnp.dot(
        x, m_ref[...], preferred_element_type=jnp.float32
    ).astype(o_ref.dtype)


def _round_up(n, m):
    return -(-n // m) * m


def _row_tile_cap(in_itemsize, out_itemsize):
    """Largest rows-per-tile keeping 2x-buffered in+out tiles inside the
    scoped-VMEM default of the current TPU generation."""
    try:
        kind = jax.devices()[0].device_kind.lower()
    except Exception:
        kind = ""
    # v5e scoped-VMEM default is 16 MiB; v6e/v7x default to 32 MiB.
    budget = (8 << 20) if "v5" in kind else (16 << 20)
    per_row = 128 * 2 * (in_itemsize + out_itemsize)  # double-buffered in+out
    return max(256, (budget // per_row) // 8 * 8)


def _pick_row_tile(rows, cap):
    """Rows per grid step: big tiles (low per-step overhead) but an even
    number of steps (>=4) so a v7x megacore splits the batch evenly."""
    if rows <= 2048:
        return rows                        # single step, full-extent block
    steps = max(4, pl.cdiv(rows, cap))
    steps += steps % 2                     # even step count for 2-TC chips
    tile = _round_up(pl.cdiv(rows, steps), 8)
    return max(256, min(tile, cap))


def rotation_forward(x, rotation, translation, *, row_tile=None,
                     small_batch_threshold=16384):
    """a[b] = inv(se3) @ x[b] @ se3 for a batch of 4x4 matrices.

    x: (B, 4, 4).  rotation: (4, 3).  translation: (4, 1).
    """
    assert x.ndim == 3 and x.shape[-2:] == (4, 4), x.shape
    B = x.shape[0]
    out_dtype = x.dtype

    # ---- tiny parameter glue stays in plain JAX -----------------------------
    se3 = jnp.concatenate([rotation, translation], axis=1).astype(jnp.float32)
    inv_se3 = jnp.linalg.inv(se3)   # general (trainable) rotation block

    # Tiny/medium batches: per-call + per-step overhead dwarfs ~B*64 bytes of
    # real traffic, so the fused einsum is faster than launching the kernel.
    if B <= small_batch_threshold:
        out = jnp.einsum("ij,bjk,kl->bil", inv_se3,
                         x.astype(jnp.float32), se3)
        return out.astype(out_dtype)

    # Conjugation matrix (row-major vec identity), replicated block-diagonally
    # so 8 packed matrices share one MXU pass.
    m16 = jnp.kron(inv_se3.T, se3)                               # (16, 16)
    m_big = jnp.kron(jnp.eye(8, dtype=jnp.float32), m16)         # (128, 128)

    # ---- lane-dense packing: 8 matrices per 128-lane row --------------------
    # Pad only to a multiple of 8 matrices (no copy when B % 8 == 0); the
    # reshapes are layout-preserving for a row-major contiguous array.
    b_pad = _round_up(B, 8)
    x_flat = x.reshape(B, 16)
    if b_pad != B:
        x_flat = jnp.pad(x_flat, ((0, b_pad - B), (0, 0)))
    rows = b_pad // 8
    x_packed = x_flat.reshape(rows, 128)          # keeps x.dtype through HBM

    in_itemsize = x.dtype.itemsize
    out_itemsize = jnp.dtype(out_dtype).itemsize
    if row_tile is None:
        row_tile = _pick_row_tile(rows, _row_tile_cap(in_itemsize, out_itemsize))
    grid = (pl.cdiv(rows, row_tile),)   # ragged last block handled by Pallas

    out_packed = pl.pallas_call(
        _conj_kernel,
        out_shape=jax.ShapeDtypeStruct((rows, 128), out_dtype),
        grid_spec=pltpu.PrefetchScalarGridSpec(
            num_scalar_prefetch=0,
            grid=grid,
            in_specs=[
                pl.BlockSpec((128, 128), lambda i: (0, 0)),        # m_big (resident)
                pl.BlockSpec((row_tile, 128), lambda i: (i, 0)),   # x tile
            ],
            out_specs=pl.BlockSpec((row_tile, 128), lambda i: (i, 0)),
        ),
        compiler_params=pltpu.CompilerParams(
            dimension_semantics=("parallel",),
        ),
        cost_estimate=pl.CostEstimate(
            flops=2 * rows * 128 * 128,           # actual MXU work incl. kron
            bytes_accessed=rows * 128 * (in_itemsize + out_itemsize)
                           + 128 * 128 * 4,
            transcendentals=0,
        ),
    )(m_big, x_packed)

    out = out_packed.reshape(b_pad, 4, 4)
    if b_pad != B:
        out = out[:B]
    return out                                    # already in out_dtype


if __name__ == "__main__":
    # Deterministic parameter init, exactly as in the module's __init__.
    rotation = jnp.array(
        [[1.0, 0.0, 0.0],
         [0.0, 1.0, 0.0],
         [0.0, 0.0, 1.0],
         [0.0, 0.0, 0.0]], dtype=jnp.float32)
    translation = jnp.array(
        [[0.0],
         [0.0],
         [0.0],
         [1.0]], dtype=jnp.float32)

    key = jax.random.PRNGKey(0)
    k_x, k_rot = jax.random.split(key, 2)

    # Small batch of homogeneous 4x4 matrices (odd size exercises padding
    # and the ragged last block).
    B = 4099
    x = jax.random.normal(k_x, (B, 4, 4), dtype=jnp.float32)

    fwd = jax.jit(rotation_forward,
                  static_argnames=("row_tile", "small_batch_threshold"))

    # 1) Module's default (identity-ish) parameters, single-step kernel path
    #    (small_batch_threshold=0 forces the Pallas kernel at this small B).
    out = jax.block_until_ready(
        fwd(x, rotation, translation, small_batch_threshold=0))
    se3 = jnp.concatenate([rotation, translation], axis=1)
    ref = jnp.einsum("ij,bjk,kl->bil", jnp.linalg.inv(se3), x, se3)
    assert out.shape == x.shape and out.dtype == x.dtype
    assert jnp.allclose(out, ref, atol=1e-3, rtol=1e-3)

    # 2) Perturbed parameters, forced small tile -> multi-step grid with a
    #    ragged last block (the path large batches take).
    rot2 = rotation + 0.1 * jax.random.normal(k_rot, (4, 3), dtype=jnp.float32)
    out2 = jax.block_until_ready(
        fwd(x, rot2, translation, row_tile=128, small_batch_threshold=0))
    se3_2 = jnp.concatenate([rot2, translation], axis=1)
    ref2 = jnp.einsum("ij,bjk,kl->bil", jnp.linalg.inv(se3_2), x, se3_2)
    assert jnp.allclose(out2, ref2, atol=1e-3, rtol=1e-3)

    # 3) Default threshold -> plain-JAX fallback for tiny batches.
    out3 = jax.block_until_ready(fwd(x[:64], rot2, translation))
    assert jnp.allclose(out3, ref2[:64], atol=1e-3, rtol=1e-3)

    print("KERNEL_OK")
</pallas_src>

<mosaic_0001>
module attributes {stable_mosaic.version = 11 : i64} {
  func.func @_conj_kernel(%arg0: i32, %arg1: memref<128x128xf32, #tpu.memory_space<vmem>>, %arg2: memref<513x128xf32, #tpu.memory_space<vmem>>, %arg3: memref<513x128xf32, #tpu.memory_space<vmem>>) attributes {dimension_semantics = [#tpu.dimension_semantics<parallel>], iteration_bounds = array<i64: 1>, scalar_prefetch = 0 : i64, scratch_operands = 0 : i64, tpu.core_type = #tpu.core_type<tc>, window_params = [{pipeline_mode = #tpu.pipeline_mode<synchronous>, transform_indices = @transform_0, window_bounds = array<i64: 128, 128>}, {transform_indices = @transform_1, window_bounds = array<i64: 513, 128>}, {transform_indices = @transform_2, window_bounds = array<i64: 513, 128>}]} {
    %c0 = arith.constant 0 : index
    %c0_0 = arith.constant 0 : index
    %0 = vector.load %arg2[%c0, %c0_0] : memref<513x128xf32, #tpu.memory_space<vmem>>, vector<513x128xf32>
    %c0_1 = arith.constant 0 : index
    %c0_2 = arith.constant 0 : index
    %1 = vector.load %arg1[%c0_1, %c0_2] : memref<128x128xf32, #tpu.memory_space<vmem>>, vector<128x128xf32>
    %cst = arith.constant dense<0.000000e+00> : vector<513x128xf32>
    %2 = tpu.matmul %0, %1, %cst {dimension_numbers = #tpu.dot_dimension_numbers<[1], [0], [0], [1], [0, 0, 1, 1], [], []>} : vector<513x128xf32>, vector<128x128xf32>, vector<513x128xf32> -> vector<513x128xf32>
    %c0_3 = arith.constant 0 : index
    %c0_4 = arith.constant 0 : index
    %3 = vector.load %arg3[%c0_3, %c0_4] : memref<513x128xf32, #tpu.memory_space<vmem>>, vector<513x128xf32>
    tpu.vector_store %arg3[%c0_3, %c0_4], %2 {strides = array<i32>} : memref<513x128xf32, #tpu.memory_space<vmem>>, vector<513x128xf32>,
    return
  }
  func.func @transform_0(%arg0: i32) -> (i32, i32) {
    %c0_i32 = arith.constant 0 : i32
    %c0_i32_0 = arith.constant 0 : i32
    %c0_i32_1 = arith.constant 0 : i32
    return %c0_i32, %c0_i32_0 : i32, i32
  }
  func.func @transform_1(%arg0: i32) -> (i32, i32) {
    %c0_i32 = arith.constant 0 : i32
    %c0_i32_0 = arith.constant 0 : i32
    return %arg0, %c0_i32 : i32, i32
  }
  func.func @transform_2(%arg0: i32) -> (i32, i32) {
    %c0_i32 = arith.constant 0 : i32
    %c0_i32_0 = arith.constant 0 : i32
    return %arg0, %c0_i32 : i32, i32
  }
}

</mosaic_0001>

<bundles_post_ra>
// kernel: custom-call.11
= control target key start
LH: loop header
LB: loop body
LE: loop exit
PB: predicated region body
PF: predicated region fallthrough
CT: control target
= control target key end

     0   :  { %5 = vsyncpa [#allocation6], 0  ;;  %v69_v1 = vlaneseq  ;;  %v523_v2 = vmov 0   ;;  %s552_s14 = smov 0   ;;  %s597_s0 = inlined_call_operand.vmem [shape: f32[4,4], index: 0, kind: input, shape index: {}]   ;;  %s598_s1 = inlined_call_operand.vmem [shape: f32[4,4], index: 1, kind: output, shape index: {0}]   ;;  %s599_s2 = inlined_call_operand.hbm [shape: s32[4], index: 2, kind: output, shape index: {1}]   ;;  %s600_s3 = inlined_call_operand.vmem [shape: s32[4], index: 3, kind: output, shape index: {2}]  }
   0x1   :  { %v60_v0 = vld [vmem:[%s597_s0] sm:$0xf]  ;;  %68 = vst [vmem:[#allocation4] sm:$0x1] %v523_v2 }
   0x2   :  { %61 = vst [vmem:[#allocation1] sm:$0xf] %v60_v0  ;;  %v549_v3 = vshrl.u32 %v69_v1, 7 }
   0x4   :  { %73 = vst [vmem:[#allocation9] sm:$0xff] %v549_v3 }
   0x9   :  { %v64_v4 = vld [vmem:[#allocation1] sm:$0xf] }
   0xa   :  { %65 = vst [vmem:[#allocation0] sm:$0xf] %v64_v4 }
  0x11   :  { %v66_v5 = vld [vmem:[#allocation0] sm:$0xff] }
  0x12   :  { %67 = vst [vmem:[#allocation2] sm:$0xff] %v66_v5 }
  0x13 LB: > { %vm89_vm0 = vcmp.lt.s32.totalorder %v549_v3, 4  ;;  %v559_v8 = vstv %s521_s14  ;;  %s130_s0 = ssub.s32 128, %s521_s14  ;;  %v136_v39 = vand.u32 127, %v69_v1  ;;  %s142_s15 = scalar_lea.vmem [#allocation2], %s521_s14  ;;  %v139_v42 = vld [vmem:[#allocation4] ss:$0 sm:$0xff]  ;;  %s521_s14 = sphi %s552_s14, %s79_s14  }
  0x14   : > { %vm88_vm1 = vcmp.ge.s32.totalorder %v549_v3, %v559_v8  ;;  %s148_s18 = scalar_lea.vmem [#allocation9], %s521_s14  ;;  %vm168_vm14 = vcmp.gt.s32.totalorder %v549_v3, %v559_v8  ;;  %s79_s14 = sadd.s32 1, %s521_s14  }
  0x15   : > { %vm90_vm3 = vmand %vm88_vm1, %vm89_vm0  ;;  %vm137_vm12 = vcmp.eq.s32.totalorder %v136_v39, %v559_v8  ;;  %v150_v44 = vld [vmem:[%s148_s18] ss:$0 sm:$0xff]  ;;  %p76_p0 = scmp.ge.s32.totalorder %s79_s14, 4  }
  0x16   :  { %s524_s20 = smov (%p76_p0), [#allocation5]   ;;  %s322_s24 = sshll.u32 (%p76_p0), %s599_s2, 4  ;;  %s323_s24 = int_to_ptr.hbm [resolvable:$true] %s322_s24 }
  0x17   :  { %s320_s21 = sshll.u32 (%p76_p0), %s524_s20, 4  ;;  %s321_s21 = int_to_ptr.vmem [resolvable:$true] %s320_s21 }
  0x19   : > { %v84_v6 = vld [vmem:[#allocation2] sm:$0xff]  ;;  %v144_v40 = vld [vmem:[%s142_s15] ss:$0 sm:$0xff] }
  0x1a   : > { %v85_v7 = vand.u32 2147483647, %v84_v6 }
  0x1c   : > { %vm468_vm2 = vcmp.gt.f32.partialorder %v85_v7, -inf }
  0x1d   : > { %vm92_vm4 = vmand %vm90_vm3, %vm468_vm2 }
  0x1e   : > { %v93_v9 = vsel %vm92_vm4, %v549_v3, %v559_v8  ;;  %v94_v10 = vsel %vm92_vm4, %v85_v7, -inf  ;;  %vm185_vm4 = vmand %vm168_vm14, %vm137_vm12 }
  0x1f   : > { %v95_v11 = vrot.slane %v94_v10, 1  ;;  %v96_v12 = vrot.slane %v93_v9, 1 }
  0x21   : > { %vm97_vm5 = vcmp.ge.f32.partialorder %v95_v11, %v94_v10  ;;  %v100_v13 = vrot.slane %v95_v11, 1  ;;  %v101_v14 = vrot.slane %v96_v12, 1 }
  0x22   : > { %v98_v15 = vsel %vm97_vm5, %v95_v11, %v94_v10  ;;  %v99_v16 = vsel %vm97_vm5, %v96_v12, %v93_v9  ;;  %vm160_vm5 = vcmp.gt.s32.totalorder %v136_v39, %v559_v8 }
  0x23   : > { %vm102_vm6 = vcmp.ge.f32.partialorder %v100_v13, %v98_v15  ;;  %v105_v17 = vrot.slane %v100_v13, 1  ;;  %v106_v18 = vrot.slane %v101_v14, 1 }
  0x24   : > { %v103_v19 = vsel %vm102_vm6, %v100_v13, %v98_v15  ;;  %v104_v20 = vsel %vm102_vm6, %v101_v14, %v99_v16 }
  0x25   : > { %vm107_vm7 = vcmp.ge.f32.partialorder %v105_v17, %v103_v19  ;;  %v110_v21 = vrot.slane %v105_v17, 1  ;;  %v111_v22 = vrot.slane %v106_v18, 1 }
  0x26   : > { %v108_v23 = vsel %vm107_vm7, %v105_v17, %v103_v19  ;;  %v109_v24 = vsel %vm107_vm7, %v106_v18, %v104_v20 }
  0x27   : > { %vm112_vm8 = vcmp.ge.f32.partialorder %v110_v21, %v108_v23  ;;  %v115_v25 = vrot.slane %v110_v21, 1  ;;  %v116_v26 = vrot.slane %v111_v22, 1 }
  0x28   : > { %v113_v27 = vsel %vm112_vm8, %v110_v21, %v108_v23  ;;  %v114_v28 = vsel %vm112_vm8, %v111_v22, %v109_v24 }
  0x29   : > { %vm117_vm9 = vcmp.ge.f32.partialorder %v115_v25, %v113_v27  ;;  %v120_v29 = vrot.slane %v115_v25, 1  ;;  %v121_v30 = vrot.slane %v116_v26, 1 }
  0x2a   : > { %v118_v31 = vsel %vm117_vm9, %v115_v25, %v113_v27  ;;  %v119_v32 = vsel %vm117_vm9, %v116_v26, %v114_v28 }
  0x2b   : > { %vm122_vm10 = vcmp.ge.f32.partialorder %v120_v29, %v118_v31  ;;  %v125_v33 = vrot.slane %v120_v29, 1  ;;  %v126_v34 = vrot.slane %v121_v30, 1 }
  0x2c   : > { %v123_v35 = vsel %vm122_vm10, %v120_v29, %v118_v31  ;;  %v124_v36 = vsel %vm122_vm10, %v121_v30, %v119_v32 }
  0x2d   : > { %vm127_vm11 = vcmp.ge.f32.partialorder %v125_v33, %v123_v35 }
  0x2e   : > { %v129_v37 = vsel %vm127_vm11, %v126_v34, %v124_v36 }
  0x2f   : > { %131 = vrot.lane.b32.xlu0 %v129_v37, %s130_s0 }
  0xa1   : > { %v132_v38 = vpop.permute.xlu0 %131 }
  0xa2   : > { %475 = vpush %v132_v38 }
  0xd3   : > { %s476_s16 = spop %475 }
  0xd4   : > { %v138_v41 = vstv %s476_s16  ;;  %s143_s17 = scalar_lea.vmem [#allocation2], %s476_s16  ;;  %s149_s19 = scalar_lea.vmem [#allocation9], %s476_s16 }
  0xd5   : > { %v145_v43 = vld [vmem:[%s143_s17] ss:$0 sm:$0xff]  ;;  %v140_v46 = vsel %vm137_vm12, %v138_v41, %v139_v42 }
  0xd6   : > { %v151_v45 = vld [vmem:[%s149_s19] ss:$0 sm:$0xff]  ;;  %146 = vst [vmem:[%s143_s17] sm:$0x1] %v144_v40  ;;  %vm154_vm13 = vcmp.ne.f32.partialorder %v145_v43, 0.0  ;;  %v161_v62 = vsel %vm160_vm5, %v145_v43, 0.0 }
  0xd7   : > { %147 = vst [vmem:[%s142_s15] sm:$0x1] %v145_v43  ;;  %vm155_vm15 = vmand %vm137_vm12, %vm154_vm13 }
  0xd8   : > { %152 = vst [vmem:[%s149_s19] sm:$0x1] %v150_v44  ;;  %v156_v47 = vsel %vm155_vm15, %v145_v43, 1.0 }
  0xd9   : > { %153 = vst [vmem:[%s148_s18] sm:$0x1] %v151_v45  ;;  %v169_v48 = vsel %vm168_vm14, %v156_v47, 1.0 }
  0xda   : > { %487 = vrcp.f32 %v169_v48  ;;  %141 = vst [vmem:[#allocation4] sm:$0x1] %v140_v46  ;;  %v181_v52 = vand.u32 2147483648, %v169_v48  ;;  %v179_v54 = vand.u32 2147483647, %v169_v48  ;;  %vm175_vm1 = vweird.f32 %v169_v48 }
  0xdc   : > { %v182_v56 = vor.u32 1.1754944e-38, %v181_v52  ;;  %vm180_vm3 = vcmp.eq.f32.partialorder %v179_v54, 8.507059e+37 }
  0xde   : > { %v165_v58 = vld [vmem:[#allocation2] sm:$0xff] }
  0xe0   : > { %v488_v49 = vpop.eup %487  ;;  %v192_v4 = vld [vmem:[#allocation9] sm:$0xff] (%p76_p0) }
  0xe1   : > { %v171_v50 = vmul.f32 %v488_v49, %v169_v48  ;;  %vm176_vm0 = vweird.f32 %v488_v49  ;;  %v249_v6 = vld [vmem:[#allocation4] sm:$0x1] (%p76_p0) }
  0xe2   : > { %vm177_vm2 = vmor %vm175_vm1, %vm176_vm0  ;;  %252 = vst [vmem:[#allocation5] sm:$0x1] (%p76_p0), %v249_v6 }
  0xe3   : > { %v172_v51 = vsub.f32 1.0, %v171_v50  ;;  %325 = dma.vmem_to_hbm [thread:$0]  (%p76_p0), %s321_s21, 16, %s323_s24, [#allocation6]  }
  0xe5   : > { %v173_v53 = vmul.f32 %v488_v49, %v172_v51 }
  0xe7   : > { %v174_v55 = vadd.f32 %v488_v49, %v173_v53 }
  0xe9   : > { %v178_v57 = vsel %vm177_vm2, %v488_v49, %v174_v55 }
  0xea   : > { %v183_v59 = vsel %vm180_vm3, %v182_v56, %v178_v57 }
  0xeb   : > { %v184_v60 = vmul.f32 %v183_v59, %v165_v58 }
  0xed   : > { %v186_v61 = vsel %vm185_vm4, %v184_v60, 0.0 }
  0xee   : > { %187 = vadd.xlane.f32.xlu0 %v186_v61 }
 0x117   :  { %208 = vxpose.xlu0.b32.start.end [1/1] (short) (narrow) (%p76_p0), %v192_v4, 8 }
 0x161   : > { %v188_v63 = vpop.xlane.xlu0 %187 }
 0x162   : > { %v189_v0 = vmul.f32 %v188_v63, %v161_v62  ;;  %78 = sbr.rel (!%p76_p0) target bundleno = 19 (0x13), region = 163 }
 0x164   : > { %v190_v2 = vsub.f32 %v184_v60, %v189_v0 }
 0x166   : > { %191 = vst [vmem:[#allocation2] sm:$0xff] %v190_v2 }
 0x16d   :  { %v243_v5 = vld [vmem:[#allocation2] sm:$0xf] }
 0x16e   :  { %246 = vst [vmem:[#allocation3] sm:$0xf] %v243_v5 }
 0x175   :  { %v313_v7 = vld [vmem:[#allocation3] sm:$0xf] }
 0x176   :  { %314 = vst [vmem:[%s598_s1] sm:$0xf] %v313_v7 }
 0x1bb   :  { %v224_v1 = vpop.trf.xlu0 }
 0x1bc   :  { %240 = vst [vmem:[#allocation7] sm:$0x1] %v224_v1 }
 0x1c3   :  { %v255_v3 = vld [vmem:[#allocation7] sm:$0x1] }
 0x1c4   :  { %258 = vst [vmem:[#allocation8] sm:$0x1] %v255_v3 }
 0x1cb   :  { %v382_v8 = vld [vmem:[#allocation8] sm:$0x1] }
 0x1cc   :  { %383 = vst [vmem:[%s600_s3] sm:$0x1] %v382_v8 }
 0x1cd   :  { %517 = dma.done.wait [#allocation6], 16  }
 0x1ce   :  { %518 = vsyncadd [#allocation6], 4294967280 }
 0x1cf   :  { %390 = vsyncpa [#allocation6], 1 }

// kernel: custom-call.12
= control target key start
LH: loop header
LB: loop body
LE: loop exit
PB: predicated region body
PF: predicated region fallthrough
CT: control target
= control target key end

     0   :  { %v39_v1 = vlaneseq  ;;  %v177_v20 = vmov -1.0   ;;  %s196_s0 = inlined_call_operand.vmem [shape: f32[1,4,4], index: 0, kind: input, shape index: {}]   ;;  %s197_s1 = inlined_call_operand.vmem [shape: f32[1,4,4], index: 1, kind: output, shape index: {}]  }
   0x1   :  { %v18_v0 = vld [vmem:[%s196_s0] sm:$0xf] }
   0x2   :  { %19 = vst [vmem:[#allocation1] sm:$0xf] %v18_v0  ;;  %v40_v3 = vand.u32 127, %v39_v1  ;;  %v43_v4 = vshrl.u32 %v39_v1, 7 }
   0x4   :  { %vm45_vm0 = vcmp.eq.s32.totalorder %v43_v4, %v40_v3  ;;  %vm41_vm1 = vcmp.lt.s32.totalorder %v40_v3, 4  ;;  %vm50_vm2 = vcmp.le.s32.totalorder %v43_v4, %v40_v3  ;;  %vm77_vm8 = vcmp.eq.s32.totalorder %v40_v3, 3 }
   0x5   :  { %vm51_vm3 = vmand %vm50_vm2, %vm41_vm1  ;;  %vm74_vm9 = vcmp.eq.s32.totalorder %v40_v3, %v43_v4  ;;  %v78_v21 = vsel %vm77_vm8, 1.0, %v177_v20  ;;  %vm85_vm10 = vcmp.eq.s32.totalorder %v40_v3, 2  ;;  %vm95_vm11 = vcmp.eq.s32.totalorder %v40_v3, 1 }
   0x6   :  { %v79_v22 = vsel %vm74_vm9, %v78_v21, 0.0  ;;  %vm104_vm12 = vcmp.eq.s32.totalorder %v40_v3, 0 }
   0x9   :  { %v37_v2 = vld [vmem:[#allocation1] sm:$0xf] }
   0xa   :  { %38 = vst [vmem:[#allocation0] sm:$0xf] %v37_v2 }
  0x11   :  { %v46_v5 = vld [vmem:[#allocation0] sm:$0xff] }
  0x12   :  { %v47_v6 = vsel %vm45_vm0, %v46_v5, 0.0  ;;  %v52_v15 = vsel %vm51_vm3, %v46_v5, 0.0 }
  0x13   :  { %48 = vadd.xlane.f32.xlu0 %v47_v6 }
  0x86   :  { %v49_v7 = vpop.xlane.xlu0 %48 }
  0x87   :  { %175 = vrcp.f32 %v49_v7  ;;  %v64_v11 = vand.u32 2147483648, %v49_v7  ;;  %v62_v13 = vand.u32 2147483647, %v49_v7  ;;  %vm58_vm5 = vweird.f32 %v49_v7 }
  0x89   :  { %v65_v16 = vor.u32 1.1754944e-38, %v64_v11  ;;  %vm63_vm7 = vcmp.eq.f32.partialorder %v62_v13, 8.507059e+37 }
  0x8d   :  { %v176_v8 = vpop.eup %175 }
  0x8e   :  { %v54_v9 = vmul.f32 %v176_v8, %v49_v7  ;;  %vm59_vm4 = vweird.f32 %v176_v8 }
  0x8f   :  { %vm60_vm6 = vmor %vm58_vm5, %vm59_vm4 }
  0x90   :  { %v55_v10 = vsub.f32 1.0, %v54_v9 }
  0x92   :  { %v56_v12 = vmul.f32 %v176_v8, %v55_v10 }
  0x94   :  { %v57_v14 = vadd.f32 %v176_v8, %v56_v12 }
  0x96   :  { %v61_v17 = vsel %vm60_vm6, %v176_v8, %v57_v14 }
  0x97   :  { %v66_v18 = vsel %vm63_vm7, %v65_v16, %v61_v17 }
  0x98   :  { %v67_v19 = vmul.f32 %v66_v18, %v52_v15 }
  0x9a   :  { %68 = vst [vmem:[#allocation4] sm:$0xff] %v67_v19 }
  0xa1   :  { %v81_v23 = vld [vmem:[#allocation4 + $0x2] ss:$0 sm:$0xff]  ;;  %v91_v26 = vld [vmem:[#allocation4 + $0x1] ss:$0 sm:$0xff]  ;;  %v100_v31 = vld [vmem:[#allocation4] ss:$0 sm:$0xff] }
  0xa2   :  { %v82_v24 = vxor.u32 2147483648, %v81_v23  ;;  %v92_v28 = vxor.u32 2147483648, %v91_v26  ;;  %v101_v33 = vxor.u32 2147483648, %v100_v31 }
  0xa4   :  { %v86_v25 = vmul.f32 %v82_v24, %v79_v22 }
  0xa6   :  { %87 = vadd.xlane.f32.xlu0 %v86_v25 }
 0x119   :  { %v88_v27 = vpop.xlane.xlu0 %87 }
 0x11a   :  { %v89_v29 = vsel %vm85_vm10, %v88_v27, %v79_v22 }
 0x11b   :  { %v96_v30 = vmul.f32 %v92_v28, %v89_v29 }
 0x11d   :  { %97 = vadd.xlane.f32.xlu1 %v96_v30 }
 0x190   :  { %v98_v32 = vpop.xlane.xlu1 %97 }
 0x191   :  { %v99_v34 = vsel %vm95_vm11, %v98_v32, %v89_v29 }
 0x192   :  { %v105_v35 = vmul.f32 %v101_v33, %v99_v34 }
 0x194   :  { %106 = vadd.xlane.f32.xlu1 %v105_v35 }
 0x207   :  { %v107_v36 = vpop.xlane.xlu1 %106 }
 0x208   :  { %v108_v37 = vsel %vm104_vm12, %v107_v36, %v99_v34 }
 0x209   :  { %v123_v38 = vmul.f32 %v108_v37, %v66_v18 }
 0x20b   :  { %v125_v39 = vsel %vm58_vm5, %v108_v37, %v123_v38 }
 0x20c   :  { %126 = vst [vmem:[#allocation2] sm:$0xff] %v125_v39 }
 0x213   :  { %v129_v40 = vld [vmem:[#allocation2] sm:$0xf] }
 0x214   :  { %132 = vst [vmem:[#allocation3] sm:$0xf] %v129_v40 }
 0x21b   :  { %v149_v41 = vld [vmem:[#allocation3] sm:$0xf] }
 0x21c   :  { %150 = vst [vmem:[%s197_s1] sm:$0xf] %v149_v41 }

// kernel: custom-call.13
= control target key start
LH: loop header
LB: loop body
LE: loop exit
PB: predicated region body
PF: predicated region fallthrough
CT: control target
= control target key end

     0   :  { %v39_v1 = vlaneseq  ;;  %v178_v20 = vmov -1.0   ;;  %s197_s0 = inlined_call_operand.vmem [shape: f32[1,4,4], index: 0, kind: input, shape index: {}]   ;;  %s198_s1 = inlined_call_operand.vmem [shape: f32[1,4,4], index: 1, kind: output, shape index: {}]  }
   0x1   :  { %v18_v0 = vld [vmem:[%s197_s0] sm:$0xf] }
   0x2   :  { %19 = vst [vmem:[#allocation1] sm:$0xf] %v18_v0  ;;  %v40_v3 = vand.u32 127, %v39_v1  ;;  %v43_v4 = vshrl.u32 %v39_v1, 7 }
   0x4   :  { %vm45_vm0 = vcmp.eq.s32.totalorder %v43_v4, %v40_v3  ;;  %vm41_vm1 = vcmp.lt.s32.totalorder %v40_v3, 4  ;;  %vm50_vm2 = vcmp.ge.s32.totalorder %v43_v4, %v40_v3  ;;  %vm77_vm8 = vcmp.eq.s32.totalorder %v40_v3, 0 }
   0x5   :  { %vm51_vm3 = vmand %vm50_vm2, %vm41_vm1  ;;  %vm74_vm9 = vcmp.eq.s32.totalorder %v40_v3, %v43_v4  ;;  %v78_v21 = vsel %vm77_vm8, 1.0, %v178_v20  ;;  %vm85_vm10 = vcmp.eq.s32.totalorder %v40_v3, 1  ;;  %vm95_vm11 = vcmp.eq.s32.totalorder %v40_v3, 2 }
   0x6   :  { %v79_v22 = vsel %vm74_vm9, %v78_v21, 0.0  ;;  %vm105_vm12 = vcmp.eq.s32.totalorder %v40_v3, 3 }
   0x9   :  { %v37_v2 = vld [vmem:[#allocation1] sm:$0xf] }
   0xa   :  { %38 = vst [vmem:[#allocation0] sm:$0xf] %v37_v2 }
  0x11   :  { %v46_v5 = vld [vmem:[#allocation0] sm:$0xff] }
  0x12   :  { %v47_v6 = vsel %vm45_vm0, %v46_v5, 0.0  ;;  %v52_v15 = vsel %vm51_vm3, %v46_v5, 0.0 }
  0x13   :  { %48 = vadd.xlane.f32.xlu0 %v47_v6 }
  0x86   :  { %v49_v7 = vpop.xlane.xlu0 %48 }
  0x87   :  { %176 = vrcp.f32 %v49_v7  ;;  %v64_v11 = vand.u32 2147483648, %v49_v7  ;;  %v62_v13 = vand.u32 2147483647, %v49_v7  ;;  %vm58_vm5 = vweird.f32 %v49_v7 }
  0x89   :  { %v65_v16 = vor.u32 1.1754944e-38, %v64_v11  ;;  %vm63_vm7 = vcmp.eq.f32.partialorder %v62_v13, 8.507059e+37 }
  0x8d   :  { %v177_v8 = vpop.eup %176 }
  0x8e   :  { %v54_v9 = vmul.f32 %v177_v8, %v49_v7  ;;  %vm59_vm4 = vweird.f32 %v177_v8 }
  0x8f   :  { %vm60_vm6 = vmor %vm58_vm5, %vm59_vm4 }
  0x90   :  { %v55_v10 = vsub.f32 1.0, %v54_v9 }
  0x92   :  { %v56_v12 = vmul.f32 %v177_v8, %v55_v10 }
  0x94   :  { %v57_v14 = vadd.f32 %v177_v8, %v56_v12 }
  0x96   :  { %v61_v17 = vsel %vm60_vm6, %v177_v8, %v57_v14 }
  0x97   :  { %v66_v18 = vsel %vm63_vm7, %v65_v16, %v61_v17 }
  0x98   :  { %v67_v19 = vmul.f32 %v66_v18, %v52_v15 }
  0x9a   :  { %68 = vst [vmem:[#allocation4] sm:$0xff] %v67_v19 }
  0xa1   :  { %v81_v23 = vld [vmem:[#allocation4 + $0x1] ss:$0 sm:$0xff]  ;;  %v91_v26 = vld [vmem:[#allocation4 + $0x2] ss:$0 sm:$0xff]  ;;  %v101_v31 = vld [vmem:[#allocation4 + $0x3] ss:$0 sm:$0xff] }
  0xa2   :  { %v82_v24 = vxor.u32 2147483648, %v81_v23  ;;  %v92_v28 = vxor.u32 2147483648, %v91_v26  ;;  %v102_v33 = vxor.u32 2147483648, %v101_v31 }
  0xa4   :  { %v86_v25 = vmul.f32 %v82_v24, %v79_v22 }
  0xa6   :  { %87 = vadd.xlane.f32.xlu0 %v86_v25 }
 0x119   :  { %v88_v27 = vpop.xlane.xlu0 %87 }
 0x11a   :  { %v89_v29 = vsel %vm85_vm10, %v88_v27, %v79_v22 }
 0x11b   :  { %v96_v30 = vmul.f32 %v92_v28, %v89_v29 }
 0x11d   :  { %97 = vadd.xlane.f32.xlu1 %v96_v30 }
 0x190   :  { %v98_v32 = vpop.xlane.xlu1 %97 }
 0x191   :  { %v99_v34 = vsel %vm95_vm11, %v98_v32, %v89_v29 }
 0x192   :  { %v106_v35 = vmul.f32 %v102_v33, %v99_v34 }
 0x194   :  { %107 = vadd.xlane.f32.xlu1 %v106_v35 }
 0x207   :  { %v108_v36 = vpop.xlane.xlu1 %107 }
 0x208   :  { %v109_v37 = vsel %vm105_vm12, %v108_v36, %v99_v34 }
 0x209   :  { %v124_v38 = vmul.f32 %v109_v37, %v66_v18 }
 0x20b   :  { %v126_v39 = vsel %vm58_vm5, %v109_v37, %v124_v38 }
 0x20c   :  { %127 = vst [vmem:[#allocation2] sm:$0xff] %v126_v39 }
 0x213   :  { %v130_v40 = vld [vmem:[#allocation2] sm:$0xf] }
 0x214   :  { %133 = vst [vmem:[#allocation3] sm:$0xf] %v130_v40 }
 0x21b   :  { %v150_v41 = vld [vmem:[#allocation3] sm:$0xf] }
 0x21c   :  { %151 = vst [vmem:[%s198_s1] sm:$0xf] %v150_v41 }

// kernel: rotation_forward.1
= control target key start
LH: loop header
LB: loop body
LE: loop exit
PB: predicated region body
PF: predicated region fallthrough
CT: control target
= control target key end

     0   :  { %s874_s0 = inlined_call_operand.vmem [shape: f32[128,128], index: 0, kind: input, shape index: {}]   ;;  %s875_s1 = inlined_call_operand.vmem [shape: f32[513,128], index: 1, kind: input, shape index: {}]   ;;  %s876_s2 = inlined_call_operand.vmem [shape: f32[513,128], index: 2, kind: output, shape index: {}]  }
   0x1   :  { %v91_v0 = vld [vmem:[%s874_s0 + $0x78] sm:$0xff]  ;;  %v90_v1 = vld [vmem:[%s874_s0 + $0x70] sm:$0xff]  ;;  %v89_v2 = vld [vmem:[%s874_s0 + $0x68] sm:$0xff] }
   0x2   :  { %374 = vmatpush.msra.mxu2 %v91_v0  ;;  %375 = vmatpush.msra.mxu3 %v91_v0  ;;  %v88_v3 = vld [vmem:[%s874_s0 + $0x60] sm:$0xff]  ;;  %v87_v4 = vld [vmem:[%s874_s0 + $0x58] sm:$0xff]  ;;  %v86_v5 = vld [vmem:[%s874_s0 + $0x50] sm:$0xff] }
   0x3   :  { %373 = vmatpush.msra.mxu1 %v91_v0  ;;  %92 = vmatpush.msra.mxu0 %v91_v0  ;;  %v85_v6 = vld [vmem:[%s874_s0 + $0x48] sm:$0xff]  ;;  %v84_v7 = vld [vmem:[%s874_s0 + $0x40] sm:$0xff]  ;;  %v83_v8 = vld [vmem:[%s874_s0 + $0x38] sm:$0xff] }
   0x4   :  { %377 = vmatpush.msra.mxu2 %v90_v1  ;;  %378 = vmatpush.msra.mxu3 %v90_v1  ;;  %v82_v9 = vld [vmem:[%s874_s0 + $0x30] sm:$0xff]  ;;  %v81_v10 = vld [vmem:[%s874_s0 + $0x28] sm:$0xff]  ;;  %v80_v11 = vld [vmem:[%s874_s0 + $0x20] sm:$0xff] }
   0x5   :  { %376 = vmatpush.msra.mxu1 %v90_v1  ;;  %93 = vmatpush.msra.mxu0 %v90_v1  ;;  %v79_v12 = vld [vmem:[%s874_s0 + $0x18] sm:$0xff]  ;;  %v78_v13 = vld [vmem:[%s874_s0 + $0x10] sm:$0xff]  ;;  %v77_v14 = vld [vmem:[%s874_s0 + $0x8] sm:$0xff] }
   0x6   :  { %380 = vmatpush.msra.mxu2 %v89_v2  ;;  %381 = vmatpush.msra.mxu3 %v89_v2  ;;  %v76_v15 = vld [vmem:[%s874_s0] sm:$0xff]  ;;  %v42_v16 = vld [vmem:[%s875_s1 + $0xf8] sm:$0xff]  ;;  %v60_v21 = vld [vmem:[%s875_s1 + $0x188] sm:$0xff] }
   0x7   :  { %379 = vmatpush.msra.mxu1 %v89_v2  ;;  %94 = vmatpush.msra.mxu0 %v89_v2  ;;  %v59_v17 = vld [vmem:[%s875_s1 + $0x180] sm:$0xff]  ;;  %v26_v18 = vld [vmem:[%s875_s1 + $0x78] sm:$0xff]  ;;  %v12_v23 = vld [vmem:[%s875_s1 + $0x8] sm:$0xff] }
   0x8   :  { %383 = vmatpush.msra.mxu2 %v88_v3  ;;  %384 = vmatpush.msra.mxu3 %v88_v3  ;;  %v11_v19 = vld [vmem:[%s875_s1] sm:$0xff]  ;;  %v44_v24 = vld [vmem:[%s875_s1 + $0x108] sm:$0xff]  ;;  %v61_v25 = vld [vmem:[%s875_s1 + $0x190] sm:$0xff] }
   0x9   :  { %382 = vmatpush.msra.mxu1 %v88_v3  ;;  %95 = vmatpush.msra.mxu0 %v88_v3  ;;  %v43_v20 = vld [vmem:[%s875_s1 + $0x100] sm:$0xff]  ;;  %v28_v26 = vld [vmem:[%s875_s1 + $0x88] sm:$0xff]  ;;  %v13_v27 = vld [vmem:[%s875_s1 + $0x10] sm:$0xff] }
   0xa   :  { %386 = vmatpush.msra.mxu2 %v87_v4  ;;  %387 = vmatpush.msra.mxu3 %v87_v4  ;;  %v27_v22 = vld [vmem:[%s875_s1 + $0x80] sm:$0xff]  ;;  %v45_v28 = vld [vmem:[%s875_s1 + $0x110] sm:$0xff]  ;;  %v62_v29 = vld [vmem:[%s875_s1 + $0x198] sm:$0xff] }
   0xb   :  { %385 = vmatpush.msra.mxu1 %v87_v4  ;;  %96 = vmatpush.msra.mxu0 %v87_v4  ;;  %v29_v30 = vld [vmem:[%s875_s1 + $0x90] sm:$0xff]  ;;  %v14_v31 = vld [vmem:[%s875_s1 + $0x18] sm:$0xff]  ;;  %v63_v33 = vld [vmem:[%s875_s1 + $0x1a0] sm:$0xff] }
   0xc   :  { %389 = vmatpush.msra.mxu2 %v86_v5  ;;  %390 = vmatpush.msra.mxu3 %v86_v5  ;;  %v46_v32 = vld [vmem:[%s875_s1 + $0x118] sm:$0xff]  ;;  %v15_v35 = vld [vmem:[%s875_s1 + $0x20] sm:$0xff]  ;;  %v64_v37 = vld [vmem:[%s875_s1 + $0x1a8] sm:$0xff] }
   0xd   :  { %388 = vmatpush.msra.mxu1 %v86_v5  ;;  %97 = vmatpush.msra.mxu0 %v86_v5  ;;  %v30_v34 = vld [vmem:[%s875_s1 + $0x98] sm:$0xff]  ;;  %v47_v36 = vld [vmem:[%s875_s1 + $0x120] sm:$0xff]  ;;  %v16_v39 = vld [vmem:[%s875_s1 + $0x28] sm:$0xff] }
   0xe   :  { %392 = vmatpush.msra.mxu2 %v85_v6  ;;  %393 = vmatpush.msra.mxu3 %v85_v6  ;;  %v31_v38 = vld [vmem:[%s875_s1 + $0xa0] sm:$0xff]  ;;  %v48_v40 = vld [vmem:[%s875_s1 + $0x128] sm:$0xff]  ;;  %v65_v41 = vld [vmem:[%s875_s1 + $0x1b0] sm:$0xff] }
   0xf   :  { %391 = vmatpush.msra.mxu1 %v85_v6  ;;  %98 = vmatpush.msra.mxu0 %v85_v6  ;;  %v32_v42 = vld [vmem:[%s875_s1 + $0xa8] sm:$0xff]  ;;  %v17_v43 = vld [vmem:[%s875_s1 + $0x30] sm:$0xff]  ;;  %v66_v45 = vld [vmem:[%s875_s1 + $0x1b8] sm:$0xff] }
  0x10   :  { %395 = vmatpush.msra.mxu2 %v84_v7  ;;  %396 = vmatpush.msra.mxu3 %v84_v7  ;;  %v49_v44 = vld [vmem:[%s875_s1 + $0x130] sm:$0xff]  ;;  %v18_v47 = vld [vmem:[%s875_s1 + $0x38] sm:$0xff]  ;;  %v67_v49 = vld [vmem:[%s875_s1 + $0x1c0] sm:$0xff] }
  0x11   :  { %394 = vmatpush.msra.mxu1 %v84_v7  ;;  %99 = vmatpush.msra.mxu0 %v84_v7  ;;  %v33_v46 = vld [vmem:[%s875_s1 + $0xb0] sm:$0xff]  ;;  %v50_v48 = vld [vmem:[%s875_s1 + $0x138] sm:$0xff]  ;;  %v19_v51 = vld [vmem:[%s875_s1 + $0x40] sm:$0xff] }
  0x12   :  { %398 = vmatpush.msra.mxu2 %v83_v8  ;;  %399 = vmatpush.msra.mxu3 %v83_v8  ;;  %v34_v50 = vld [vmem:[%s875_s1 + $0xb8] sm:$0xff]  ;;  %v51_v52 = vld [vmem:[%s875_s1 + $0x140] sm:$0xff]  ;;  %v68_v53 = vld [vmem:[%s875_s1 + $0x1c8] sm:$0xff] }
  0x13   :  { %397 = vmatpush.msra.mxu1 %v83_v8  ;;  %100 = vmatpush.msra.mxu0 %v83_v8  ;;  %v35_v54 = vld [vmem:[%s875_s1 + $0xc0] sm:$0xff]  ;;  %v20_v55 = vld [vmem:[%s875_s1 + $0x48] sm:$0xff]  ;;  %v69_v57 = vld [vmem:[%s875_s1 + $0x1d0] sm:$0xff] }
  0x14   :  { %401 = vmatpush.msra.mxu2 %v82_v9  ;;  %402 = vmatpush.msra.mxu3 %v82_v9  ;;  %v52_v56 = vld [vmem:[%s875_s1 + $0x148] sm:$0xff]  ;;  %v21_v59 = vld [vmem:[%s875_s1 + $0x50] sm:$0xff]  ;;  %v70_v61 = vld [vmem:[%s875_s1 + $0x1d8] sm:$0xff] }
  0x15   :  { %400 = vmatpush.msra.mxu1 %v82_v9  ;;  %101 = vmatpush.msra.mxu0 %v82_v9  ;;  %v36_v58 = vld [vmem:[%s875_s1 + $0xc8] sm:$0xff]  ;;  %v53_v60 = vld [vmem:[%s875_s1 + $0x150] sm:$0xff]  ;;  %v22_v63 = vld [vmem:[%s875_s1 + $0x58] sm:$0xff] }
  0x16   :  { %404 = vmatpush.msra.mxu2 %v81_v10  ;;  %405 = vmatpush.msra.mxu3 %v81_v10  ;;  %v37_v62 = vld [vmem:[%s875_s1 + $0xd0] sm:$0xff]  ;;  %v54_v0 = vld [vmem:[%s875_s1 + $0x158] sm:$0xff]  ;;  %v71_v1 = vld [vmem:[%s875_s1 + $0x1e0] sm:$0xff] }
  0x17   :  { %403 = vmatpush.msra.mxu1 %v81_v10  ;;  %102 = vmatpush.msra.mxu0 %v81_v10  ;;  %v38_v2 = vld [vmem:[%s875_s1 + $0xd8] sm:$0xff]  ;;  %v23_v3 = vld [vmem:[%s875_s1 + $0x60] sm:$0xff]  ;;  %v72_v5 = vld [vmem:[%s875_s1 + $0x1e8] sm:$0xff] }
  0x18   :  { %407 = vmatpush.msra.mxu2 %v80_v11  ;;  %408 = vmatpush.msra.mxu3 %v80_v11  ;;  %v55_v4 = vld [vmem:[%s875_s1 + $0x160] sm:$0xff]  ;;  %v24_v7 = vld [vmem:[%s875_s1 + $0x68] sm:$0xff]  ;;  %v73_v9 = vld [vmem:[%s875_s1 + $0x1f0] sm:$0xff] }
  0x19   :  { %406 = vmatpush.msra.mxu1 %v80_v11  ;;  %103 = vmatpush.msra.mxu0 %v80_v11  ;;  %v39_v6 = vld [vmem:[%s875_s1 + $0xe0] sm:$0xff]  ;;  %v56_v8 = vld [vmem:[%s875_s1 + $0x168] sm:$0xff]  ;;  %v25_v11 = vld [vmem:[%s875_s1 + $0x70] sm:$0xff] }
  0x1a   :  { %410 = vmatpush.msra.mxu2 %v79_v12  ;;  %411 = vmatpush.msra.mxu3 %v79_v12  ;;  %v40_v10 = vld [vmem:[%s875_s1 + $0xe8] sm:$0xff] }
  0x1b   :  { %409 = vmatpush.msra.mxu1 %v79_v12  ;;  %104 = vmatpush.msra.mxu0 %v79_v12  ;;  %v57_v12 = vld [vmem:[%s875_s1 + $0x170] sm:$0xff] }
  0x1c   :  { %413 = vmatpush.msra.mxu2 %v78_v13  ;;  %414 = vmatpush.msra.mxu3 %v78_v13 }
  0x1d   :  { %412 = vmatpush.msra.mxu1 %v78_v13  ;;  %105 = vmatpush.msra.mxu0 %v78_v13  ;;  %v74_v13 = vld [vmem:[%s875_s1 + $0x1f8] sm:$0xff] }
  0x1e   :  { %416 = vmatpush.msra.mxu2 %v77_v14  ;;  %417 = vmatpush.msra.mxu3 %v77_v14 }
  0x1f   :  { %415 = vmatpush.msra.mxu1 %v77_v14  ;;  %106 = vmatpush.msra.mxu0 %v77_v14  ;;  %v41_v14 = vld [vmem:[%s875_s1 + $0xf0] sm:$0xff] }
  0x20   :  { %419 = vmatpush.msra.mxu2 %v76_v15  ;;  %420 = vmatpush.msra.mxu3 %v76_v15 }
  0x21   :  { %201 = vmatmul.f32.vlgmr.msra.gmra.mxu2 %v42_v16  ;;  %252 = vmatmul.f32.vlgmr.msra.gmra.mxu3 %v59_v17  ;;  %v75_v16 = vld [vmem:[%s875_s1 + $0x200] sm:$0x1] }
  0x22   :  { %418 = vmatpush.msra.mxu1 %v76_v15  ;;  %107 = vmatpush.msra.mxu0 %v76_v15  ;;  %v58_v15 = vld [vmem:[%s875_s1 + $0x178] sm:$0xff] }
  0x23   :  { %153 = vmatmul.f32.vlgmr.msra.gmra.mxu1 %v26_v18  ;;  %108 = vmatmul.f32.vlgmr.msra.gmra.mxu0 %v11_v19 }
  0x29   :  { %204 = vmatmul.f32.gmra.mxu2 %v43_v20  ;;  %255 = vmatmul.f32.gmra.mxu3 %v60_v21 }
  0x2b   :  { %156 = vmatmul.f32.gmra.mxu1 %v27_v22  ;;  %111 = vmatmul.f32.gmra.mxu0 %v12_v23 }
  0x31   :  { %207 = vmatmul.f32.gmra.mxu2 %v44_v24  ;;  %258 = vmatmul.f32.gmra.mxu3 %v61_v25 }
  0x33   :  { %159 = vmatmul.f32.gmra.mxu1 %v28_v26  ;;  %114 = vmatmul.f32.gmra.mxu0 %v13_v27 }
  0x39   :  { %210 = vmatmul.f32.gmra.mxu2 %v45_v28  ;;  %261 = vmatmul.f32.gmra.mxu3 %v62_v29 }
  0x3b   :  { %162 = vmatmul.f32.gmra.mxu1 %v29_v30  ;;  %117 = vmatmul.f32.gmra.mxu0 %v14_v31 }
  0x41   :  { %213 = vmatmul.f32.gmra.mxu2 %v46_v32  ;;  %264 = vmatmul.f32.gmra.mxu3 %v63_v33 }
  0x43   :  { %165 = vmatmul.f32.gmra.mxu1 %v30_v34  ;;  %120 = vmatmul.f32.gmra.mxu0 %v15_v35 }
  0x49   :  { %216 = vmatmul.f32.gmra.mxu2 %v47_v36  ;;  %267 = vmatmul.f32.gmra.mxu3 %v64_v37 }
  0x4b   :  { %168 = vmatmul.f32.gmra.mxu1 %v31_v38  ;;  %123 = vmatmul.f32.gmra.mxu0 %v16_v39 }
  0x51   :  { %219 = vmatmul.f32.gmra.mxu2 %v48_v40  ;;  %270 = vmatmul.f32.gmra.mxu3 %v65_v41 }
  0x53   :  { %171 = vmatmul.f32.gmra.mxu1 %v32_v42  ;;  %126 = vmatmul.f32.gmra.mxu0 %v17_v43 }
  0x59   :  { %222 = vmatmul.f32.gmra.mxu2 %v49_v44  ;;  %273 = vmatmul.f32.gmra.mxu3 %v66_v45 }
  0x5b   :  { %174 = vmatmul.f32.gmra.mxu1 %v33_v46  ;;  %129 = vmatmul.f32.gmra.mxu0 %v18_v47 }
  0x61   :  { %225 = vmatmul.f32.gmra.mxu2 %v50_v48  ;;  %276 = vmatmul.f32.gmra.mxu3 %v67_v49 }
  0x63   :  { %177 = vmatmul.f32.gmra.mxu1 %v34_v50  ;;  %132 = vmatmul.f32.gmra.mxu0 %v19_v51 }
  0x69   :  { %228 = vmatmul.f32.gmra.mxu2 %v51_v52  ;;  %279 = vmatmul.f32.gmra.mxu3 %v68_v53 }
  0x6b   :  { %180 = vmatmul.f32.gmra.mxu1 %v35_v54  ;;  %135 = vmatmul.f32.gmra.mxu0 %v20_v55 }
  0x71   :  { %231 = vmatmul.f32.gmra.mxu2 %v52_v56  ;;  %282 = vmatmul.f32.gmra.mxu3 %v69_v57 }
  0x73   :  { %183 = vmatmul.f32.gmra.mxu1 %v36_v58  ;;  %138 = vmatmul.f32.gmra.mxu0 %v21_v59 }
  0x79   :  { %234 = vmatmul.f32.gmra.mxu2 %v53_v60  ;;  %285 = vmatmul.f32.gmra.mxu3 %v70_v61 }
  0x7b   :  { %186 = vmatmul.f32.gmra.mxu1 %v37_v62  ;;  %141 = vmatmul.f32.gmra.mxu0 %v22_v63 }
  0x81   :  { %237 = vmatmul.f32.gmra.mxu2 %v54_v0  ;;  %288 = vmatmul.f32.gmra.mxu3 %v71_v1 }
  0x83   :  { %189 = vmatmul.f32.gmra.mxu1 %v38_v2  ;;  %144 = vmatmul.f32.gmra.mxu0 %v23_v3 }
  0x89   :  { %240 = vmatmul.f32.gmra.mxu2 %v55_v4  ;;  %291 = vmatmul.f32.gmra.mxu3 %v72_v5 }
  0x8b   :  { %192 = vmatmul.f32.gmra.mxu1 %v39_v6  ;;  %147 = vmatmul.f32.gmra.mxu0 %v24_v7 }
  0x91   :  { %243 = vmatmul.f32.gmra.mxu2 %v56_v8  ;;  %294 = vmatmul.f32.gmra.mxu3 %v73_v9 }
  0x93   :  { %195 = vmatmul.f32.gmra.mxu1 %v40_v10  ;;  %150 = vmatmul.f32.gmra.mxu0 %v25_v11 }
  0x99   :  { %246 = vmatmul.f32.gmra.mxu2 %v57_v12  ;;  %297 = vmatmul.f32.gmra.mxu3 %v74_v13 }
  0x9b   :  { %198 = vmatmul.f32.gmra.mxu1 %v41_v14 }
  0xa0   :  { %v154_v17 = vpop.f32.mrf.mxu1  ;;  %v109_v18 = vpop.f32.mrf.mxu0 }
  0xa1   :  { %249 = vmatmul.f32.gmra.mxu2 %v58_v15  ;;  %300 = vmatmul.f32.gmra.mxu3 %v75_v16  ;;  %319 = vst [vmem:[%s876_s2 + $0x78] sm:$0xff] %v154_v17 }
  0xa2   :  { %304 = vst [vmem:[%s876_s2] sm:$0xff] %v109_v18 }
  0xa4   :  { %v202_v19 = vpop.f32.mrf.mxu2  ;;  %v253_v20 = vpop.f32.mrf.mxu3 }
  0xa5   :  { %335 = vst [vmem:[%s876_s2 + $0xf8] sm:$0xff] %v202_v19 }
  0xa6   :  { %352 = vst [vmem:[%s876_s2 + $0x180] sm:$0xff] %v253_v20 }
  0xa8   :  { %v157_v21 = vpop.f32.mrf.mxu1  ;;  %v112_v22 = vpop.f32.mrf.mxu0 }
  0xa9   :  { %320 = vst [vmem:[%s876_s2 + $0x80] sm:$0xff] %v157_v21 }
  0xaa   :  { %305 = vst [vmem:[%s876_s2 + $0x8] sm:$0xff] %v112_v22 }
  0xac   :  { %v205_v23 = vpop.f32.mrf.mxu2  ;;  %v256_v24 = vpop.f32.mrf.mxu3 }
  0xad   :  { %336 = vst [vmem:[%s876_s2 + $0x100] sm:$0xff] %v205_v23 }
  0xae   :  { %353 = vst [vmem:[%s876_s2 + $0x188] sm:$0xff] %v256_v24 }
  0xb0   :  { %v160_v25 = vpop.f32.mrf.mxu1  ;;  %v115_v26 = vpop.f32.mrf.mxu0 }
  0xb1   :  { %321 = vst [vmem:[%s876_s2 + $0x88] sm:$0xff] %v160_v25 }
  0xb2   :  { %306 = vst [vmem:[%s876_s2 + $0x10] sm:$0xff] %v115_v26 }
  0xb4   :  { %v208_v27 = vpop.f32.mrf.mxu2  ;;  %v259_v28 = vpop.f32.mrf.mxu3 }
  0xb5   :  { %337 = vst [vmem:[%s876_s2 + $0x108] sm:$0xff] %v208_v27 }
  0xb6   :  { %354 = vst [vmem:[%s876_s2 + $0x190] sm:$0xff] %v259_v28 }
  0xb8   :  { %v163_v29 = vpop.f32.mrf.mxu1  ;;  %v118_v30 = vpop.f32.mrf.mxu0 }
  0xb9   :  { %322 = vst [vmem:[%s876_s2 + $0x90] sm:$0xff] %v163_v29 }
  0xba   :  { %307 = vst [vmem:[%s876_s2 + $0x18] sm:$0xff] %v118_v30 }
  0xbc   :  { %v211_v31 = vpop.f32.mrf.mxu2  ;;  %v262_v32 = vpop.f32.mrf.mxu3 }
  0xbd   :  { %338 = vst [vmem:[%s876_s2 + $0x110] sm:$0xff] %v211_v31 }
  0xbe   :  { %355 = vst [vmem:[%s876_s2 + $0x198] sm:$0xff] %v262_v32 }
  0xc0   :  { %v166_v33 = vpop.f32.mrf.mxu1  ;;  %v121_v34 = vpop.f32.mrf.mxu0 }
  0xc1   :  { %323 = vst [vmem:[%s876_s2 + $0x98] sm:$0xff] %v166_v33 }
  0xc2   :  { %308 = vst [vmem:[%s876_s2 + $0x20] sm:$0xff] %v121_v34 }
  0xc4   :  { %v214_v35 = vpop.f32.mrf.mxu2  ;;  %v265_v36 = vpop.f32.mrf.mxu3 }
  0xc5   :  { %339 = vst [vmem:[%s876_s2 + $0x118] sm:$0xff] %v214_v35 }
  0xc6   :  { %356 = vst [vmem:[%s876_s2 + $0x1a0] sm:$0xff] %v265_v36 }
  0xc8   :  { %v169_v37 = vpop.f32.mrf.mxu1  ;;  %v124_v38 = vpop.f32.mrf.mxu0 }
  0xc9   :  { %324 = vst [vmem:[%s876_s2 + $0xa0] sm:$0xff] %v169_v37 }
  0xca   :  { %309 = vst [vmem:[%s876_s2 + $0x28] sm:$0xff] %v124_v38 }
  0xcc   :  { %v217_v39 = vpop.f32.mrf.mxu2  ;;  %v268_v40 = vpop.f32.mrf.mxu3 }
  0xcd   :  { %340 = vst [vmem:[%s876_s2 + $0x120] sm:$0xff] %v217_v39 }
  0xce   :  { %357 = vst [vmem:[%s876_s2 + $0x1a8] sm:$0xff] %v268_v40 }
  0xd0   :  { %v172_v41 = vpop.f32.mrf.mxu1  ;;  %v127_v42 = vpop.f32.mrf.mxu0 }
  0xd1   :  { %325 = vst [vmem:[%s876_s2 + $0xa8] sm:$0xff] %v172_v41 }
  0xd2   :  { %310 = vst [vmem:[%s876_s2 + $0x30] sm:$0xff] %v127_v42 }
  0xd4   :  { %v220_v43 = vpop.f32.mrf.mxu2  ;;  %v271_v44 = vpop.f32.mrf.mxu3 }
  0xd5   :  { %341 = vst [vmem:[%s876_s2 + $0x128] sm:$0xff] %v220_v43 }
  0xd6   :  { %358 = vst [vmem:[%s876_s2 + $0x1b0] sm:$0xff] %v271_v44 }
  0xd8   :  { %v175_v45 = vpop.f32.mrf.mxu1  ;;  %v130_v46 = vpop.f32.mrf.mxu0 }
  0xd9   :  { %326 = vst [vmem:[%s876_s2 + $0xb0] sm:$0xff] %v175_v45 }
  0xda   :  { %311 = vst [vmem:[%s876_s2 + $0x38] sm:$0xff] %v130_v46 }
  0xdc   :  { %v223_v47 = vpop.f32.mrf.mxu2  ;;  %v274_v48 = vpop.f32.mrf.mxu3 }
  0xdd   :  { %342 = vst [vmem:[%s876_s2 + $0x130] sm:$0xff] %v223_v47 }
  0xde   :  { %359 = vst [vmem:[%s876_s2 + $0x1b8] sm:$0xff] %v274_v48 }
  0xe0   :  { %v178_v49 = vpop.f32.mrf.mxu1  ;;  %v133_v50 = vpop.f32.mrf.mxu0 }
  0xe1   :  { %327 = vst [vmem:[%s876_s2 + $0xb8] sm:$0xff] %v178_v49 }
  0xe2   :  { %312 = vst [vmem:[%s876_s2 + $0x40] sm:$0xff] %v133_v50 }
  0xe4   :  { %v226_v51 = vpop.f32.mrf.mxu2  ;;  %v277_v52 = vpop.f32.mrf.mxu3 }
  0xe5   :  { %343 = vst [vmem:[%s876_s2 + $0x138] sm:$0xff] %v226_v51 }
  0xe6   :  { %360 = vst [vmem:[%s876_s2 + $0x1c0] sm:$0xff] %v277_v52 }
  0xe8   :  { %v181_v53 = vpop.f32.mrf.mxu1  ;;  %v136_v54 = vpop.f32.mrf.mxu0 }
  0xe9   :  { %328 = vst [vmem:[%s876_s2 + $0xc0] sm:$0xff] %v181_v53 }
  0xea   :  { %313 = vst [vmem:[%s876_s2 + $0x48] sm:$0xff] %v136_v54 }
  0xec   :  { %v229_v55 = vpop.f32.mrf.mxu2  ;;  %v280_v56 = vpop.f32.mrf.mxu3 }
  0xed   :  { %344 = vst [vmem:[%s876_s2 + $0x140] sm:$0xff] %v229_v55 }
  0xee   :  { %361 = vst [vmem:[%s876_s2 + $0x1c8] sm:$0xff] %v280_v56 }
  0xf0   :  { %v184_v57 = vpop.f32.mrf.mxu1  ;;  %v139_v58 = vpop.f32.mrf.mxu0 }
  0xf1   :  { %329 = vst [vmem:[%s876_s2 + $0xc8] sm:$0xff] %v184_v57 }
  0xf2   :  { %314 = vst [vmem:[%s876_s2 + $0x50] sm:$0xff] %v139_v58 }
  0xf4   :  { %v232_v59 = vpop.f32.mrf.mxu2  ;;  %v283_v60 = vpop.f32.mrf.mxu3 }
  0xf5   :  { %345 = vst [vmem:[%s876_s2 + $0x148] sm:$0xff] %v232_v59 }
  0xf6   :  { %362 = vst [vmem:[%s876_s2 + $0x1d0] sm:$0xff] %v283_v60 }
  0xf8   :  { %v187_v61 = vpop.f32.mrf.mxu1  ;;  %v142_v62 = vpop.f32.mrf.mxu0 }
  0xf9   :  { %330 = vst [vmem:[%s876_s2 + $0xd0] sm:$0xff] %v187_v61 }
  0xfa   :  { %315 = vst [vmem:[%s876_s2 + $0x58] sm:$0xff] %v142_v62 }
  0xfc   :  { %v235_v63 = vpop.f32.mrf.mxu2  ;;  %v286_v0 = vpop.f32.mrf.mxu3 }
  0xfd   :  { %346 = vst [vmem:[%s876_s2 + $0x150] sm:$0xff] %v235_v63 }
  0xfe   :  { %363 = vst [vmem:[%s876_s2 + $0x1d8] sm:$0xff] %v286_v0 }
 0x100   :  { %v190_v1 = vpop.f32.mrf.mxu1  ;;  %v145_v2 = vpop.f32.mrf.mxu0 }
 0x101   :  { %331 = vst [vmem:[%s876_s2 + $0xd8] sm:$0xff] %v190_v1 }
 0x102   :  { %316 = vst [vmem:[%s876_s2 + $0x60] sm:$0xff] %v145_v2 }
 0x104   :  { %v238_v3 = vpop.f32.mrf.mxu2  ;;  %v289_v4 = vpop.f32.mrf.mxu3 }
 0x105   :  { %347 = vst [vmem:[%s876_s2 + $0x158] sm:$0xff] %v238_v3 }
 0x106   :  { %364 = vst [vmem:[%s876_s2 + $0x1e0] sm:$0xff] %v289_v4 }
 0x108   :  { %v193_v5 = vpop.f32.mrf.mxu1  ;;  %v148_v6 = vpop.f32.mrf.mxu0 }
 0x109   :  { %332 = vst [vmem:[%s876_s2 + $0xe0] sm:$0xff] %v193_v5 }
 0x10a   :  { %317 = vst [vmem:[%s876_s2 + $0x68] sm:$0xff] %v148_v6 }
 0x10c   :  { %v241_v7 = vpop.f32.mrf.mxu2  ;;  %v292_v8 = vpop.f32.mrf.mxu3 }
 0x10d   :  { %348 = vst [vmem:[%s876_s2 + $0x160] sm:$0xff] %v241_v7 }
 0x10e   :  { %365 = vst [vmem:[%s876_s2 + $0x1e8] sm:$0xff] %v292_v8 }
 0x110   :  { %v196_v9 = vpop.f32.mrf.mxu1  ;;  %v151_v10 = vpop.f32.mrf.mxu0 }
 0x111   :  { %333 = vst [vmem:[%s876_s2 + $0xe8] sm:$0xff] %v196_v9 }
 0x112   :  { %318 = vst [vmem:[%s876_s2 + $0x70] sm:$0xff] %v151_v10 }
 0x114   :  { %v244_v11 = vpop.f32.mrf.mxu2  ;;  %v295_v12 = vpop.f32.mrf.mxu3 }
 0x115   :  { %349 = vst [vmem:[%s876_s2 + $0x168] sm:$0xff] %v244_v11 }
 0x116   :  { %366 = vst [vmem:[%s876_s2 + $0x1f0] sm:$0xff] %v295_v12 }
 0x118   :  { %v199_v13 = vpop.f32.mrf.mxu1 }
 0x119   :  { %334 = vst [vmem:[%s876_s2 + $0xf0] sm:$0xff] %v199_v13 }
 0x11c   :  { %v247_v14 = vpop.f32.mrf.mxu2  ;;  %v298_v15 = vpop.f32.mrf.mxu3 }
 0x11d   :  { %350 = vst [vmem:[%s876_s2 + $0x170] sm:$0xff] %v247_v14 }
 0x11e   :  { %367 = vst [vmem:[%s876_s2 + $0x1f8] sm:$0xff] %v298_v15 }
 0x124   :  { %v250_v16 = vpop.f32.mrf.mxu2  ;;  %v301_v17 = vpop.f32.mrf.mxu3 }
 0x125   :  { %351 = vst [vmem:[%s876_s2 + $0x178] sm:$0xff] %v250_v16 }
 0x126   :  { %368 = vst [vmem:[%s876_s2 + $0x200] sm:$0x1] %v301_v17 }

</bundles_post_ra>
